<compile_context>
chip_gen: v7x
topology: tpu7x:2x2x1
jax: 0.10.0
libtpu: 0.0.40
codegen_flags: <defaults>
</compile_context>

<pallas_src>
import jax
import jax.numpy as jnp
import numpy as np
from jax.experimental import pallas as pl
from jax.experimental.pallas import tpu as pltpu


def _round_up(x, m):
    return (x + m - 1) // m * m


def spherical_embedding_kernel(xt_ref, c_ref, p_ref, o_ref):
    # xt_ref: (3, TB)                 points, batch on lanes (lane-dense coords)
    # c_ref : (depth, 3)              centers
    # p_ref : (3, depth, dim_pad, 1)  projection, dim on sublanes, lane width 1
    # o_ref : (TB, depth*dim_pad)     batch-major output tile
    depth = c_ref.shape[0]
    dim_pad = p_ref.shape[2]
    tb = xt_ref.shape[1]
    n_out = depth * dim_pad
    k_pad = _round_up(n_out, 128)          # 128-aligned transpose shape

    x0 = xt_ref[0:1, :]                    # (1, TB)
    x1 = xt_ref[1:2, :]
    x2 = xt_ref[2:3, :]

    dx = x0 - c_ref[:, 0:1]                # (depth, TB) lane-dense VPU
    dy = x1 - c_ref[:, 1:2]
    dz = x2 - c_ref[:, 2:3]

    rxy2 = dx * dx + dy * dy
    rho = jnp.sqrt(rxy2 + dz * dz)         # (depth, TB)
    phi = jnp.arctan2(dy, dx)              # (depth, TB)
    # theta = acos(dz/rho) rewritten divide-free; identical for rho > 0.
    theta = jnp.arctan2(jnp.sqrt(rxy2), dz)
    # Preserve torch.acos(dz/rho)'s NaN at the degenerate rho == 0 point.
    theta = jnp.where(rho > 0.0, theta, jnp.nan)

    p0 = p_ref[0]                          # (depth, dim_pad, 1), dim on sublanes
    p1 = p_ref[1]
    p2 = p_ref[2]

    # einsum('bdi,dij->bdj') with i == 3 as broadcast MACs on the VPU (exact f32).
    out3 = (rho[:, None, :] * p0 + phi[:, None, :] * p1) + theta[:, None, :] * p2
    # (depth, dim_pad, TB) -> (depth*dim_pad, TB): dim_pad % 8 == 0, so this is
    # a pure leading-dim collapse (no relayout).
    out2 = out3.reshape(n_out, tb)
    if k_pad > n_out:
        out2 = jnp.concatenate(
            [out2, jnp.zeros((k_pad - n_out, tb), out2.dtype)], axis=0)
    # Single in-kernel XLU transpose (both dims 128/8-aligned) instead of an
    # XLA-side full-output transpose pass.
    out_bt = out2.T                         # (TB, k_pad)
    o_ref[...] = out_bt[:, :n_out].astype(o_ref.dtype)


def _pick_block_b(B, n_out, *, target_tile_bytes=2 << 20, max_block=4096):
    # Aim for a ~2 MiB f32 output tile; keep block_b a multiple of 128, cap at
    # 4096 rows, and keep >= 2 grid steps (v7x: 2 TensorCores) when B allows.
    per_row = max(4 * n_out, 1)
    bb = (target_tile_bytes // per_row) // 128 * 128
    bb = int(min(max(bb, 128), max_block))
    b_pad128 = _round_up(B, 128)
    if b_pad128 >= 256:
        half = max((b_pad128 // 2) // 128 * 128, 128)
        bb = min(bb, half)
    return min(bb, b_pad128)


def _vmem_limit_bytes(block_b, depth, dim_pad, n_out, k_pad):
    f32 = 4
    in_tiles = 2 * 3 * block_b * f32                       # double-buffered x tile
    consts = depth * 3 * f32 + 3 * depth * dim_pad * 128 * f32
    out_lane = _round_up(n_out, 128)
    out_tiles = 2 * block_b * out_lane * f32               # double-buffered out tile
    temps = (10 * depth * block_b * f32                    # coord temporaries
             + 3 * k_pad * block_b * f32)                  # MAC / pad / transpose temps
    est = in_tiles + consts + out_tiles + temps
    return int(min(max(2 * est, 16 * 2 ** 20), 64 * 2 ** 20))


def spherical_embedding(x, centers, random_projection, *, center_shift=None,
                        spherical_shift=None, spherical_scale=None,
                        block_b=None, out_dtype=None):
    if spherical_shift is not None or spherical_scale is not None:
        # TODO(synk): spherical_shift / spherical_scale of the PyTorch forward
        # are not plumbed through the kernel (default-None path only).
        raise NotImplementedError("spherical_shift/spherical_scale not supported")
    if center_shift is not None:
        x = x + center_shift

    assert x.ndim == 2 and x.shape[-1] == 3, "Input must be Bx3"
    B = x.shape[0]
    depth = centers.shape[0]
    dim = random_projection.shape[-1]
    out_dtype = x.dtype if out_dtype is None else out_dtype

    dim_pad = _round_up(dim, 8)            # keeps the in-kernel reshape layout-free
    n_out = depth * dim_pad
    k_pad = _round_up(n_out, 128)

    if block_b is None:
        block_b = _pick_block_b(B, n_out)
    b_pad = pl.cdiv(B, block_b) * block_b

    # Wrapper-side layout plumbing (all tiny: inputs are 12 B/point):
    xt = jnp.transpose(x.astype(jnp.float32), (1, 0))                  # (3, B)
    if b_pad != B:
        xt = jnp.pad(xt, ((0, 0), (0, b_pad - B)))                     # (3, B_pad)
    c = centers.astype(jnp.float32)                                    # (depth, 3)
    proj = random_projection.astype(jnp.float32)                       # (depth, 3, dim)
    if dim_pad != dim:
        proj = jnp.pad(proj, ((0, 0), (0, 0), (0, dim_pad - dim)))
    pt = jnp.transpose(proj, (1, 0, 2))[..., None]                     # (3, depth, dim_pad, 1)

    grid = (b_pad // block_b,)
    out2 = pl.pallas_call(
        spherical_embedding_kernel,
        out_shape=jax.ShapeDtypeStruct((b_pad, n_out), out_dtype),
        grid_spec=pltpu.PrefetchScalarGridSpec(
            num_scalar_prefetch=0,
            grid=grid,
            in_specs=[
                pl.BlockSpec((3, block_b), lambda i: (0, i)),
                pl.BlockSpec((depth, 3), lambda i: (0, 0)),
                pl.BlockSpec((3, depth, dim_pad, 1), lambda i: (0, 0, 0, 0)),
            ],
            out_specs=pl.BlockSpec((block_b, n_out), lambda i: (i, 0)),
        ),
        compiler_params=pltpu.CompilerParams(
            dimension_semantics=("parallel",),
            vmem_limit_bytes=_vmem_limit_bytes(block_b, depth, dim_pad,
                                               n_out, k_pad)),
    )(xt, c, pt)

    # Free reshape when B is tile-aligned; for ragged B the prefix slice is a
    # single contiguous copy (still strictly cheaper than the old transpose).
    out = out2[:B].reshape(B, depth, dim_pad)
    if dim_pad != dim:
        out = out[:, :, :dim]
    return out


def spherical_embedding_reference(x, centers, proj):
    # Pure-elementwise f32 reference (no dot), matching the PyTorch forward.
    xe = x[:, None, :] - centers[None, :, :]
    rho = jnp.sqrt(jnp.sum(xe ** 2, axis=-1))
    phi = jnp.arctan2(xe[:, :, 1], xe[:, :, 0])
    theta = jnp.arccos(xe[:, :, 2] / rho)
    coords = jnp.stack([rho, phi, theta], axis=-1)                  # (B, depth, 3)
    return jnp.sum(coords[:, :, :, None] * proj[None, :, :, :], axis=2)


if __name__ == "__main__":
    key = jax.random.PRNGKey(0)
    k_x, k_c, k_p, k_x2 = jax.random.split(key, 4)

    depth, dim = 8, 8
    centers = jax.random.normal(k_c, (depth, 3), dtype=jnp.float32)
    random_projection = jax.random.normal(k_p, (depth, 3, dim), dtype=jnp.float32)

    # Small ragged batch (padded, single grid step).
    B1 = 16
    x1 = jax.random.normal(k_x, (B1, 3), dtype=jnp.float32)
    out1 = jax.block_until_ready(spherical_embedding(x1, centers, random_projection))
    ref1 = spherical_embedding_reference(x1, centers, random_projection)
    np.testing.assert_allclose(np.asarray(out1), np.asarray(ref1),
                               rtol=1e-5, atol=1e-5)

    # Tile-aligned batch (multi-step "parallel" grid, no padding / no slice).
    B2 = 512
    x2 = jax.random.normal(k_x2, (B2, 3), dtype=jnp.float32)
    out2 = jax.block_until_ready(spherical_embedding(x2, centers, random_projection))
    ref2 = spherical_embedding_reference(x2, centers, random_projection)
    np.testing.assert_allclose(np.asarray(out2), np.asarray(ref2),
                               rtol=1e-5, atol=1e-5)

    print("KERNEL_OK")
</pallas_src>

<mosaic_0001>
module attributes {stable_mosaic.version = 11 : i64} {
  func.func @spherical_embedding_kernel(%arg0: i32, %arg1: memref<3x128xf32, #tpu.memory_space<vmem>>, %arg2: memref<8x3xf32, #tpu.memory_space<vmem>>, %arg3: memref<3x8x8x1xf32, #tpu.memory_space<vmem>>, %arg4: memref<128x64xf32, #tpu.memory_space<vmem>>) attributes {dimension_semantics = [#tpu.dimension_semantics<parallel>], iteration_bounds = array<i64: 1>, scalar_prefetch = 0 : i64, scratch_operands = 0 : i64, tpu.core_type = #tpu.core_type<tc>, window_params = [{transform_indices = @transform_0, window_bounds = array<i64: 3, 128>}, {pipeline_mode = #tpu.pipeline_mode<synchronous>, transform_indices = @transform_1, window_bounds = array<i64: 8, 3>}, {pipeline_mode = #tpu.pipeline_mode<synchronous>, transform_indices = @transform_2, window_bounds = array<i64: 3, 8, 8, 1>}, {transform_indices = @transform_3, window_bounds = array<i64: 128, 64>}]} {
    %c0 = arith.constant 0 : index
    %c0_0 = arith.constant 0 : index
    %0 = vector.load %arg1[%c0, %c0_0] : memref<3x128xf32, #tpu.memory_space<vmem>>, vector<1x128xf32>
    %c1 = arith.constant 1 : index
    %c0_1 = arith.constant 0 : index
    %1 = vector.load %arg1[%c1, %c0_1] : memref<3x128xf32, #tpu.memory_space<vmem>>, vector<1x128xf32>
    %c2 = arith.constant 2 : index
    %c0_2 = arith.constant 0 : index
    %2 = vector.load %arg1[%c2, %c0_2] : memref<3x128xf32, #tpu.memory_space<vmem>>, vector<1x128xf32>
    %c0_3 = arith.constant 0 : index
    %c0_4 = arith.constant 0 : index
    %3 = vector.load %arg2[%c0_3, %c0_4] : memref<8x3xf32, #tpu.memory_space<vmem>>, vector<8x1xf32>
    %4 = vector.broadcast %0 : vector<1x128xf32> to vector<8x128xf32>
    %5 = vector.broadcast %3 : vector<8x1xf32> to vector<8x128xf32>
    %6 = arith.subf %4, %5 : vector<8x128xf32>
    %c0_5 = arith.constant 0 : index
    %c1_6 = arith.constant 1 : index
    %7 = vector.load %arg2[%c0_5, %c1_6] : memref<8x3xf32, #tpu.memory_space<vmem>>, vector<8x1xf32>
    %8 = vector.broadcast %1 : vector<1x128xf32> to vector<8x128xf32>
    %9 = vector.broadcast %7 : vector<8x1xf32> to vector<8x128xf32>
    %10 = arith.subf %8, %9 : vector<8x128xf32>
    %c0_7 = arith.constant 0 : index
    %c2_8 = arith.constant 2 : index
    %11 = vector.load %arg2[%c0_7, %c2_8] : memref<8x3xf32, #tpu.memory_space<vmem>>, vector<8x1xf32>
    %12 = vector.broadcast %2 : vector<1x128xf32> to vector<8x128xf32>
    %13 = vector.broadcast %11 : vector<8x1xf32> to vector<8x128xf32>
    %14 = arith.subf %12, %13 : vector<8x128xf32>
    %15 = arith.mulf %6, %6 : vector<8x128xf32>
    %16 = arith.mulf %10, %10 : vector<8x128xf32>
    %17 = arith.addf %15, %16 : vector<8x128xf32>
    %18 = arith.mulf %14, %14 : vector<8x128xf32>
    %19 = arith.addf %17, %18 : vector<8x128xf32>
    %20 = math.sqrt %19 : vector<8x128xf32>
    %21 = math.atan2 %10, %6 : vector<8x128xf32>
    %22 = math.sqrt %17 : vector<8x128xf32>
    %23 = math.atan2 %22, %14 : vector<8x128xf32>
    %cst = arith.constant 0.000000e+00 : f32
    %24 = vector.broadcast %cst : f32 to vector<8x128xf32>
    %25 = arith.cmpf ogt, %20, %24 : vector<8x128xf32>
    %cst_9 = arith.constant 0x7FC00000 : f32
    %26 = vector.broadcast %cst_9 : f32 to vector<8x128xf32>
    %27 = arith.select %25, %23, %26 : vector<8x128xi1>, vector<8x128xf32>
    %c0_10 = arith.constant 0 : index
    %c0_11 = arith.constant 0 : index
    %c0_12 = arith.constant 0 : index
    %c0_13 = arith.constant 0 : index
    %28 = vector.load %arg3[%c0_10, %c0_11, %c0_12, %c0_13] : memref<3x8x8x1xf32, #tpu.memory_space<vmem>>, vector<1x8x8x1xf32>
    %29 = vector.shape_cast %28 : vector<1x8x8x1xf32> to vector<8x8x1xf32>
    %c1_14 = arith.constant 1 : index
    %c0_15 = arith.constant 0 : index
    %c0_16 = arith.constant 0 : index
    %c0_17 = arith.constant 0 : index
    %30 = vector.load %arg3[%c1_14, %c0_15, %c0_16, %c0_17] : memref<3x8x8x1xf32, #tpu.memory_space<vmem>>, vector<1x8x8x1xf32>
    %31 = vector.shape_cast %30 : vector<1x8x8x1xf32> to vector<8x8x1xf32>
    %c2_18 = arith.constant 2 : index
    %c0_19 = arith.constant 0 : index
    %c0_20 = arith.constant 0 : index
    %c0_21 = arith.constant 0 : index
    %32 = vector.load %arg3[%c2_18, %c0_19, %c0_20, %c0_21] : memref<3x8x8x1xf32, #tpu.memory_space<vmem>>, vector<1x8x8x1xf32>
    %33 = vector.shape_cast %32 : vector<1x8x8x1xf32> to vector<8x8x1xf32>
    %34 = vector.shape_cast %20 : vector<8x128xf32> to vector<8x1x128xf32>
    %35 = vector.broadcast %34 : vector<8x1x128xf32> to vector<8x8x128xf32>
    %36 = vector.broadcast %29 : vector<8x8x1xf32> to vector<8x8x128xf32>
    %37 = arith.mulf %35, %36 : vector<8x8x128xf32>
    %38 = vector.shape_cast %21 : vector<8x128xf32> to vector<8x1x128xf32>
    %39 = vector.broadcast %38 : vector<8x1x128xf32> to vector<8x8x128xf32>
    %40 = vector.broadcast %31 : vector<8x8x1xf32> to vector<8x8x128xf32>
    %41 = arith.mulf %39, %40 : vector<8x8x128xf32>
    %42 = arith.addf %37, %41 : vector<8x8x128xf32>
    %43 = vector.shape_cast %27 : vector<8x128xf32> to vector<8x1x128xf32>
    %44 = vector.broadcast %43 : vector<8x1x128xf32> to vector<8x8x128xf32>
    %45 = vector.broadcast %33 : vector<8x8x1xf32> to vector<8x8x128xf32>
    %46 = arith.mulf %44, %45 : vector<8x8x128xf32>
    %47 = arith.addf %42, %46 : vector<8x8x128xf32>
    %48 = vector.shape_cast %47 : vector<8x8x128xf32> to vector<64x128xf32>
    %cst_22 = arith.constant 0.000000e+00 : f32
    %49 = vector.broadcast %cst_22 : f32 to vector<64x128xf32>
    %50 = tpu.concatenate %48, %49 in 0 : vector<64x128xf32>, vector<64x128xf32> -> vector<128x128xf32>
    %51 = tpu.transpose %50, [1, 0] : vector<128x128xf32> -> vector<128x128xf32>
    %52 = vector.extract_strided_slice %51 {offsets = [0, 0], sizes = [128, 64], strides = [1, 1]} : vector<128x128xf32> to vector<128x64xf32>
    %c0_23 = arith.constant 0 : index
    %c0_24 = arith.constant 0 : index
    %53 = vector.load %arg4[%c0_23, %c0_24] : memref<128x64xf32, #tpu.memory_space<vmem>>, vector<128x64xf32>
    tpu.vector_store %arg4[%c0_23, %c0_24], %52 {strides = array<i32>} : memref<128x64xf32, #tpu.memory_space<vmem>>, vector<128x64xf32>,
    return
  }
  func.func @transform_0(%arg0: i32) -> (i32, i32) {
    %c0_i32 = arith.constant 0 : i32
    %c0_i32_0 = arith.constant 0 : i32
    return %c0_i32, %arg0 : i32, i32
  }
  func.func @transform_1(%arg0: i32) -> (i32, i32) {
    %c0_i32 = arith.constant 0 : i32
    %c0_i32_0 = arith.constant 0 : i32
    %c0_i32_1 = arith.constant 0 : i32
    return %c0_i32, %c0_i32_0 : i32, i32
  }
  func.func @transform_2(%arg0: i32) -> (i32, i32, i32, i32) {
    %c0_i32 = arith.constant 0 : i32
    %c0_i32_0 = arith.constant 0 : i32
    %c0_i32_1 = arith.constant 0 : i32
    %c0_i32_2 = arith.constant 0 : i32
    %c0_i32_3 = arith.constant 0 : i32
    return %c0_i32, %c0_i32_0, %c0_i32_1, %c0_i32_2 : i32, i32, i32, i32
  }
  func.func @transform_3(%arg0: i32) -> (i32, i32) {
    %c0_i32 = arith.constant 0 : i32
    %c0_i32_0 = arith.constant 0 : i32
    return %arg0, %c0_i32 : i32, i32
  }
}

</mosaic_0001>

<bundles_post_ra>
// kernel: tpu_custom_call.1
= control target key start
LH: loop header
LB: loop body
LE: loop exit
PB: predicated region body
PF: predicated region fallthrough
CT: control target
= control target key end

     0   :  { %v708_v0 = vmov 2   ;;  %v709_v1 = vmov 0   ;;  %v710_v4 = vmov 1   ;;  %s1100_s1 = inlined_call_operand.vmem [shape: f32[8,3], index: 1, kind: input, shape index: {}]   ;;  %s1101_s2 = inlined_call_operand.vmem [shape: f32[3,8,8,1], index: 2, kind: input, shape index: {}]   ;;  %s1102_s0 = inlined_call_operand.vmem [shape: f32[3,128], index: 0, kind: input, shape index: {}]   ;;  %s1103_s3 = inlined_call_operand.vmem [shape: f32[128,64], index: 3, kind: output, shape index: {}]  }
   0x1   :  { %697 = vset.pattern.permute.xlu1 %v708_v0  ;;  %695 = vset.pattern.permute.xlu0 %v709_v1  ;;  %v17_v2 = vld [vmem:[%s1100_s1] sm:$0xff]  ;;  %v162_v6 = vld [vmem:[%s1101_s2 + $0x8] sm:$0xff]  ;;  %v163_v8 = vld [vmem:[%s1101_s2 + $0x10] sm:$0xff] }
   0x2   :  { %42 = vperm.xlu1 %697, %v17_v2   ;;  %24 = vperm.xlu0 %695, %v17_v2   ;;  %v161_v3 = vld [vmem:[%s1101_s2] sm:$0xff]  ;;  %v674_v7 = vld [vmem:[%s1101_s2 + $0x48] sm:$0xff]  ;;  %v675_v11 = vld [vmem:[%s1101_s2 + $0x50] sm:$0xff] }
   0x3   :  { %v673_v5 = vld [vmem:[%s1101_s2 + $0x40] sm:$0xff]  ;;  %v682_v10 = vld [vmem:[%s1101_s2 + $0x88] sm:$0xff]  ;;  %v676_v12 = vld [vmem:[%s1101_s2 + $0x58] sm:$0xff] }
   0x4   :  { %v681_v9 = vld [vmem:[%s1101_s2 + $0x80] sm:$0xff]  ;;  %v164_v13 = vld [vmem:[%s1101_s2 + $0x18] sm:$0xff]  ;;  %v683_v15 = vld [vmem:[%s1101_s2 + $0x90] sm:$0xff] }
   0x5   :  { %v165_v14 = vld [vmem:[%s1101_s2 + $0x20] sm:$0xff]  ;;  %v684_v16 = vld [vmem:[%s1101_s2 + $0x98] sm:$0xff]  ;;  %v678_v18 = vld [vmem:[%s1101_s2 + $0x68] sm:$0xff] }
   0x6   :  { %698 = vset.pattern.permute.xlu1 %v709_v1  ;;  %696 = vset.pattern.permute.xlu0 %v710_v4  ;;  %v677_v17 = vld [vmem:[%s1101_s2 + $0x60] sm:$0xff]  ;;  %v166_v19 = vld [vmem:[%s1101_s2 + $0x28] sm:$0xff]  ;;  %v167_v20 = vld [vmem:[%s1101_s2 + $0x30] sm:$0xff] }
   0x7   :  { %279 = vperm.xlu1 %698, %v161_v3   ;;  %33 = vperm.xlu0 %696, %v17_v2   ;;  %v685_v21 = vld [vmem:[%s1101_s2 + $0xa0] sm:$0xff]  ;;  %v686_v22 = vld [vmem:[%s1101_s2 + $0xa8] sm:$0xff]  ;;  %v679_v23 = vld [vmem:[%s1101_s2 + $0x70] sm:$0xff] }
   0x8   :  { %v680_v24 = vld [vmem:[%s1101_s2 + $0x78] sm:$0xff]  ;;  %v687_v27 = vld [vmem:[%s1101_s2 + $0xb0] sm:$0xff]  ;;  %v670_v29 = vld [vmem:[%s1102_s0] ss:$0 sm:$0xff] }
   0x9   :  { %v168_v25 = vld [vmem:[%s1101_s2 + $0x38] sm:$0xff]  ;;  %v671_v31 = vld [vmem:[%s1102_s0 + $0x1] ss:$0 sm:$0xff]  ;;  %v672_v42 = vld [vmem:[%s1102_s0 + $0x2] ss:$0 sm:$0xff] }
   0xa   :  { %v688_v26 = vld [vmem:[%s1101_s2 + $0xb8] sm:$0xff] }
   0xb   :  { %417 = vperm.xlu1 %698, %v673_v5   ;;  %699 = vset.pattern.permute.xlu0 %v709_v1 }
   0xc   :  { %284 = vperm.xlu0 %699, %v162_v6  }
   0xf   :  { %422 = vperm.xlu1 %698, %v674_v7  }
  0x10   :  { %289 = vperm.xlu0 %699, %v163_v8  }
  0x13   :  { %563 = vperm.xlu1 %698, %v681_v9  }
  0x14   :  { %568 = vperm.xlu0 %699, %v682_v10  }
  0x17   :  { %427 = vperm.xlu1 %698, %v675_v11  }
  0x18   :  { %432 = vperm.xlu0 %699, %v676_v12  }
  0x1b   :  { %294 = vperm.xlu1 %698, %v164_v13  }
  0x1c   :  { %299 = vperm.xlu0 %699, %v165_v14   ;;  %v711_v14 = vmov 1966171168  }
  0x1f   :  { %573 = vperm.xlu1 %698, %v683_v15   ;;  %v190_v15 = vunpack.c.l.s4 %v711_v14 }
  0x20   :  { %578 = vperm.xlu0 %699, %v684_v16   ;;  %v192_v16 = vlaneseq }
  0x23   :  { %437 = vperm.xlu1 %698, %v677_v17  }
  0x24   :  { %442 = vperm.xlu0 %699, %v678_v18  }
  0x27   :  { %304 = vperm.xlu1 %698, %v166_v19  }
  0x28   :  { %309 = vperm.xlu0 %699, %v167_v20  }
  0x2b   :  { %583 = vperm.xlu1 %698, %v685_v21  }
  0x2c   :  { %588 = vperm.xlu0 %699, %v686_v22  }
  0x2f   :  { %447 = vperm.xlu1 %698, %v679_v23   ;;  %v191_v23 = vunpack.c.0.s8 %v190_v15 }
  0x30   :  { %452 = vperm.xlu0 %699, %v680_v24   ;;  %v193_v24 = vshrl.u32 %v192_v16, 7 }
  0x33   :  { %314 = vperm.xlu1 %698, %v168_v25  }
  0x34   :  { %598 = vperm.xlu0 %699, %v688_v26  }
  0x37   :  { %593 = vperm.xlu1 %698, %v687_v27  }
  0x81   :  { %v25_v28 = vpop.permute.xlu0 %24  ;;  %v43_v41 = vpop.permute.xlu1 %42 }
  0x82   :  { %v812_v30 = vsub.f32 %v670_v29, %v25_v28  ;;  %v846_v46 = vsub.f32 %v672_v42, %v43_v41 }
  0x84   :  { %v46_v34 = vmul.f32 %v812_v30, %v812_v30  ;;  %v822_v35 = vand.u32 2147483647, %v812_v30  ;;  %vm92_vm0 = vcmp.ne.f32.partialorder %v812_v30, %v812_v30  ;;  %v49_v52 = vmul.f32 %v846_v46, %v846_v46 }
  0x85   :  { %v855_v53 = vand.u32 2147483647, %v846_v46  ;;  %vm88_vm8 = vcmp.lt.s32.totalorder %v812_v30, 0  ;;  %vm85_vm9 = vcmp.lt.f32.partialorder %v812_v30, 0.0  ;;  %vm142_vm14 = vcmp.lt.s32.totalorder %v846_v46, 0 }
  0x86   :  { %v34_v32 = vpop.permute.xlu0 %33  ;;  %v842_v43 = vpop.permute.xlu1 %279  ;;  %vm98_vm12 = vcmp.eq.s32.totalorder %v822_v35, inf }
  0x87   :  { %v817_v33 = vsub.f32 %v671_v31, %v34_v32 }
  0x89   :  { %v47_v36 = vmul.f32 %v817_v33, %v817_v33  ;;  %v829_v37 = vand.u32 2147483647, %v817_v33  ;;  %vm93_vm1 = vcmp.ne.f32.partialorder %v817_v33, %v817_v33  ;;  %vm90_vm11 = vcmp.eq.f32.partialorder %v817_v33, 0.0 }
  0x8a   :  { %vm833_vm2 = vmor %vm92_vm0, %vm93_vm1  ;;  %v857_v54 = vpop.permute.xlu1 %417  ;;  %vm146_vm0 = vcmp.ne.f32.partialorder %v846_v46, %v846_v46 }
  0x8b   :  { %v48_v39 = vadd.f32 %v47_v36, %v46_v34  ;;  %v61_v40 = vmax.f32 %v822_v35, %v829_v37  ;;  %v60_v44 = vmin.f32 %v822_v35, %v829_v37  ;;  %v868_v1 = vpop.permute.xlu0 %284  ;;  %v892_v36 = vsub.s32 %v191_v23, %v193_v24 }
  0x8c   :  { %vm82_vm7 = vcmp.gt.f32.partialorder %v829_v37, %v822_v35  ;;  %vm99_vm10 = vcmp.eq.s32.totalorder %v829_v37, inf }
  0x8d   :  { %700 = vrcp.f32 %v61_v40  ;;  %vm107_vm3 = vcmp.eq.f32.partialorder %v48_v39, inf  ;;  %v110_v51 = vand.u32 2147483648, %v48_v39  ;;  %vm109_vm4 = vcmp.eq.f32.partialorder %v48_v39, 0.0  ;;  %vm100_vm13 = vmand %vm98_vm12, %vm99_vm10 }
  0x8e   :  { %702 = vrsqrt.f32 %v48_v39  ;;  %v50_v60 = vadd.f32 %v49_v52, %v48_v39  ;;  %v866_v63 = vpop.permute.xlu1 %422 }
  0x8f   :  { %v872_v6 = vpop.permute.xlu0 %289 }
  0x90   :  { %vm53_vm5 = vcmp.eq.f32.partialorder %v50_v60, inf  ;;  %v56_v32 = vand.u32 2147483648, %v50_v60  ;;  %vm55_vm6 = vcmp.eq.f32.partialorder %v50_v60, 0.0 }
  0x92   :  { %v870_v4 = vpop.permute.xlu1 %563 }
  0x93   :  { %v884_v19 = vpop.permute.xlu0 %568 }
  0x96   :  { %v878_v13 = vpop.permute.xlu1 %427 }
  0x97   :  { %v701_v45 = vpop.eup %700  ;;  %v890_v34 = vpop.permute.xlu0 %432 }
  0x98   :  { %v703_v47 = vpop.eup %702  ;;  %v848_v48 = vmul.f32 %v701_v45, %v60_v44 }
  0x99   :  { %v106_v49 = vmul.f32 %v703_v47, %v48_v39 }
  0x9a   :  { %v64_v50 = vmul.f32 %v848_v48, %v848_v48  ;;  %v887_v27 = vpop.permute.xlu1 %294 }
  0x9b   :  { %v108_v55 = vsel %vm107_vm3, %v48_v39, %v106_v49  ;;  %v902_v52 = vpop.permute.xlu0 %299  ;;  %vm152_vm3 = vcmp.eq.s32.totalorder %v855_v53, inf }
  0x9c   :  { %v65_v56 = vmul.f32 0.002785687, %v64_v50  ;;  %v859_v57 = vsel %vm109_vm4, %v110_v51, %v108_v55 }
  0x9d   :  { %v862_v58 = vand.u32 2147483647, %v859_v57  ;;  %vm147_vm1 = vcmp.ne.f32.partialorder %v859_v57, %v859_v57 }
  0x9e   :  { %v66_v59 = vadd.f32 -0.015866, %v65_v56  ;;  %v897_v45 = vpop.permute.xlu1 %573 }
  0x9f   :  { %v115_v61 = vmax.f32 %v855_v53, %v862_v58  ;;  %v114_v8 = vmin.f32 %v855_v53, %v862_v58  ;;  %vm136_vm15 = vcmp.gt.f32.partialorder %v862_v58, %v855_v53  ;;  %vm153_vm4 = vcmp.eq.s32.totalorder %v862_v58, inf }
  0xa0   :  { %v67_v62 = vmul.f32 %v66_v59, %v64_v50 }
  0xa1   :  { %704 = vrcp.f32 %v115_v61 }
  0xa2   :  { %v68_v0 = vadd.f32 0.04247222, %v67_v62  ;;  %706 = vrsqrt.f32 %v50_v60  ;;  %v910_v62 = vpop.permute.xlu1 %437 }
  0xa4   :  { %v69_v2 = vmul.f32 %v68_v0, %v64_v50 }
  0xa6   :  { %v70_v3 = vadd.f32 -0.074975304, %v69_v2 }
  0xa8   :  { %v71_v5 = vmul.f32 %v70_v3, %v64_v50  ;;  %v915_v3 = vsub.s32 0, %v193_v24 }
  0xaa   :  { %v72_v7 = vadd.f32 0.1064488, %v71_v5 }
  0xab   :  { %v705_v9 = vpop.eup %704 }
  0xac   :  { %v73_v10 = vmul.f32 %v72_v7, %v64_v50  ;;  %v876_v11 = vmul.f32 %v705_v9, %v114_v8  ;;  %v707_v12 = vpop.eup %706  ;;  %v918_v8 = vpop.permute.xlu0 %578 }
  0xad   :  { %v52_v20 = vmul.f32 %v707_v12, %v50_v60  ;;  %v712_v12 = vmov 0.0  }
  0xae   :  { %v74_v17 = vadd.f32 -0.14207031, %v73_v10  ;;  %v882_v18 = vmul.f32 %v876_v11, %v876_v11  ;;  %v89_v14 = vsel %vm88_vm8, 3.1415927, %v712_v12 }
  0xaf   :  { %v54_v28 = vsel %vm53_vm5, %v50_v60, %v52_v20  ;;  %vm144_vm5 = vcmp.eq.f32.partialorder %v859_v57, 0.0 }
  0xb0   :  { %v75_v21 = vmul.f32 %v74_v17, %v64_v50  ;;  %v119_v22 = vmul.f32 0.002785687, %v882_v18  ;;  %v894_v41 = vsel %vm55_vm6, %v56_v32, %v54_v28  ;;  %v935_v38 = vpop.permute.xlu0 %442  ;;  %vm148_vm6 = vmor %vm146_vm0, %vm147_vm1 }
  0xb1   :  { %v195_v49 = vrot.slane %v894_v41, %v892_v36  ;;  %v188_v59 = vcombine.high %v894_v41, %v894_v41  ;;  %vm159_vm8 = vcmp.gt.f32.partialorder %v894_v41, 0.0 }
  0xb2   :  { %v76_v25 = vadd.f32 0.19993454, %v75_v21  ;;  %v120_v26 = vadd.f32 -0.015866, %v119_v22  ;;  %v713_v22 = vmov 0.7853982  }
  0xb3   :  { %v203_v60 = vcombine.high %v195_v49, %v195_v49  ;;  %v211_v7 = vrot.slane %v195_v49, %v892_v36  ;;  %v97_v23 = vsel %vm85_vm9, 2.3561945, %v713_v22  ;;  %v943_v49 = vsel %vm142_vm14, 3.1415927, %v712_v12 }
  0xb4   :  { %v77_v29 = vmul.f32 %v76_v25, %v64_v50  ;;  %v121_v31 = vmul.f32 %v120_v26, %v882_v18  ;;  %v305_v25 = vpop.permute.xlu1 %304 }
  0xb5   :  { %v225_v9 = vrot.slane %v203_v60, %v892_v36  ;;  %v233_v24 = vcombine.high %v211_v7, %v211_v7  ;;  %v240_v32 = vrot.slane %v211_v7, %v915_v3 }
  0xb6   :  { %v78_v39 = vadd.f32 -0.33333147, %v77_v29  ;;  %v122_v40 = vadd.f32 0.04247222, %v121_v31  ;;  %v103_v31 = vand.u32 2147483648, %v817_v33 }
  0xb7   :  { %v235_v35 = vcombine.high %v225_v9, %v225_v9 }
  0xb8   :  { %v79_v42 = vmul.f32 %v78_v39, %v64_v50  ;;  %v123_v44 = vmul.f32 %v122_v40, %v882_v18  ;;  %v244_v39 = vrot.slane %v225_v9, %v915_v3  ;;  %v951_v60 = vpop.permute.xlu1 %583  ;;  %v310_v9 = vpop.permute.xlu0 %309 }
  0xb9   :  { %v252_v33 = vrot.slane %v235_v35, %v915_v3 }
  0xba   :  { %v80_v47 = vmul.f32 %v79_v42, %v848_v48  ;;  %v124_v51 = vadd.f32 -0.074975304, %v123_v44 }
  0xbc   :  { %v81_v55 = vadd.f32 %v80_v47, %v848_v48  ;;  %v125_v56 = vmul.f32 %v124_v51, %v882_v18  ;;  %v202_v48 = vrot.slane %v188_v59, %v892_v36  ;;  %v248_v47 = vrot.slane %v233_v24, %v915_v3 }
  0xbe   :  { %v83_v50 = vsub.f32 1.5707964, %v81_v55  ;;  %v126_v61 = vadd.f32 0.1064488, %v125_v56  ;;  %v218_v20 = vrot.slane %v202_v48, %v892_v36  ;;  %v204_v21 = vcombine.high %v202_v48, %v202_v48 }
  0xbf   :  { %v317_v56 = vmul.f32 %v842_v43, %v240_v32  ;;  %v319_v7 = vmul.f32 %v872_v6, %v248_v47 }
  0xc0   :  { %v84_v0 = vsel %vm82_vm7, %v83_v50, %v81_v55  ;;  %v127_v2 = vmul.f32 %v126_v61, %v882_v18  ;;  %v940_v37 = vrot.slane %v204_v21, %v892_v36  ;;  %v234_v42 = vcombine.high %v218_v20, %v218_v20  ;;  %vm154_vm7 = vmand %vm152_vm3, %vm153_vm4 }
  0xc1   :  { %v86_v5 = vsub.f32 3.1415927, %v84_v0  ;;  %v256_v55 = vrot.slane %v218_v20, %v915_v3  ;;  %v318_v61 = vmul.f32 %v868_v1, %v244_v39 }
  0xc2   :  { %v128_v10 = vadd.f32 -0.14207031, %v127_v2  ;;  %v260_v2 = vrot.slane %v940_v37, %v915_v3  ;;  %v264_v48 = vrot.slane %v234_v42, %v915_v3  ;;  %v236_v6 = vcombine.high %v940_v37, %v940_v37 }
  0xc3   :  { %v87_v15 = vsel %vm85_vm9, %v86_v5, %v84_v0  ;;  %v321_v12 = vmul.f32 %v902_v52, %v256_v55  ;;  %vm649_vm9 = vcmask 523264  }
  0xc4   :  { %v91_v16 = vsel %vm90_vm11, %v89_v14, %v87_v15  ;;  %v129_v17 = vmul.f32 %v128_v10, %v882_v18  ;;  %v320_v10 = vmul.f32 %v887_v27, %v252_v33 }
  0xc5   :  { %v95_v30 = vsel %vm833_vm2, nan, %v91_v16  ;;  %vm139_vm2 = vcmp.lt.f32.partialorder %v846_v46, 0.0 }
  0xc6   :  { %v101_v26 = vsel %vm100_vm13, %v97_v23, %v95_v30  ;;  %v130_v28 = vadd.f32 0.19993454, %v129_v17  ;;  %v322_v30 = vmul.f32 %v305_v25, %v260_v2  ;;  %v323_v23 = vmul.f32 %v310_v9, %v264_v48 }
  0xc7   :  { %v102_v29 = vand.u32 2147483647, %v101_v26  ;;  %v268_v48 = vrot.slane %v236_v6, %v915_v3 }
  0xc8   :  { %v131_v40 = vmul.f32 %v130_v28, %v882_v18  ;;  %v448_v28 = vpop.permute.xlu1 %447 }
  0xc9   :  { %v104_v44 = vor.u32 %v103_v31, %v102_v29 }
  0xca   :  { %v132_v51 = vadd.f32 -0.33333147, %v131_v40 }
  0xcb   :  { %v333_v59 = vrot.slane %v104_v44, %v892_v36  ;;  %v326_v50 = vcombine.high %v104_v44, %v104_v44 }
  0xcc   :  { %v133_v0 = vmul.f32 %v132_v51, %v882_v18  ;;  %v315_v2 = vpop.permute.xlu1 %314 }
  0xcd   :  { %v349_v43 = vrot.slane %v333_v59, %v892_v36  ;;  %v341_v5 = vcombine.high %v333_v59, %v333_v59  ;;  %v340_v1 = vrot.slane %v326_v50, %v892_v36  ;;  %v324_v9 = vmul.f32 %v315_v2, %v268_v48 }
  0xce   :  { %v134_v18 = vmul.f32 %v133_v0, %v876_v11 }
  0xcf   :  { %v378_v14 = vrot.slane %v349_v43, %v915_v3  ;;  %v363_v15 = vrot.slane %v341_v5, %v892_v36  ;;  %v371_v16 = vcombine.high %v349_v43, %v349_v43  ;;  %v356_v17 = vrot.slane %v340_v1, %v892_v36 }
  0xd0   :  { %v135_v20 = vadd.f32 %v134_v18, %v876_v11  ;;  %v342_v21 = vcombine.high %v340_v1, %v340_v1 }
  0xd1   :  { %v455_v24 = vmul.f32 %v857_v54, %v378_v14  ;;  %v382_v27 = vrot.slane %v363_v15, %v915_v3  ;;  %v386_v52 = vrot.slane %v371_v16, %v915_v3  ;;  %v373_v26 = vcombine.high %v363_v15, %v363_v15  ;;  %v985_v54 = vpop.permute.xlu0 %588 }
  0xd2   :  { %v137_v35 = vsub.f32 1.5707964, %v135_v20  ;;  %v394_v29 = vrot.slane %v356_v17, %v915_v3  ;;  %v370_v31 = vrot.slane %v342_v21, %v892_v36  ;;  %v372_v32 = vcombine.high %v356_v17, %v356_v17 }
  0xd3   :  { %v463_v39 = vadd.f32 %v455_v24, %v317_v56  ;;  %v456_v11 = vmul.f32 %v866_v63, %v382_v27  ;;  %v457_v25 = vmul.f32 %v878_v13, %v386_v52  ;;  %v390_v40 = vrot.slane %v373_v26, %v915_v3 }
  0xd4   :  { %v138_v37 = vsel %vm136_vm15, %v137_v35, %v135_v20  ;;  %v459_v42 = vmul.f32 %v910_v62, %v394_v29  ;;  %v398_v44 = vrot.slane %v370_v31, %v915_v3  ;;  %v402_v47 = vrot.slane %v372_v32, %v915_v3 }
  0xd5   :  { %v464_v51 = vadd.f32 %v456_v11, %v318_v61  ;;  %v140_v33 = vsub.f32 3.1415927, %v138_v37  ;;  %v465_v55 = vadd.f32 %v457_v25, %v319_v7  ;;  %v458_v63 = vmul.f32 %v890_v34, %v390_v40 }
  0xd6   :  { %v467_v13 = vadd.f32 %v459_v42, %v321_v12  ;;  %v460_v56 = vmul.f32 %v935_v38, %v398_v44  ;;  %v461_v59 = vmul.f32 %v448_v28, %v402_v47  ;;  %v374_v50 = vcombine.high %v370_v31, %v370_v31  ;;  %v594_v47 = vpop.permute.xlu1 %593 }
  0xd7   :  { %v141_v0 = vsel %vm139_vm2, %v140_v33, %v138_v37  ;;  %v466_v62 = vadd.f32 %v458_v63, %v320_v10  ;;  %v151_v7 = vsel %vm139_vm2, 2.3561945, %v713_v22  ;;  %v157_v12 = vand.u32 2147483648, %v859_v57 }
  0xd8   :  { %v145_v61 = vsel %vm144_vm5, %v943_v49, %v141_v0  ;;  %v468_v34 = vadd.f32 %v460_v56, %v322_v30  ;;  %v469_v38 = vadd.f32 %v461_v59, %v323_v23  ;;  %v406_v43 = vrot.slane %v374_v50, %v915_v3  ;;  %v453_v49 = vpop.permute.xlu0 %452 }
  0xd9   :  { %v149_v5 = vsel %vm148_vm6, nan, %v145_v61 }
  0xda   :  { %v155_v1 = vsel %vm154_vm7, %v151_v7, %v149_v5  ;;  %v462_v18 = vmul.f32 %v453_v49, %v406_v43 }
  0xdb   :  { %v156_v10 = vand.u32 2147483647, %v155_v1 }
  0xdc   :  { %v470_v6 = vadd.f32 %v462_v18, %v324_v9  ;;  %v599_v63 = vpop.permute.xlu0 %598 }
  0xdd   :  { %v158_v14 = vor.u32 %v157_v12, %v156_v10 }
  0xdf   :  { %v160_v15 = vsel %vm159_vm8, %v158_v14, nan }
  0xe0   :  { %v479_v46 = vrot.slane %v160_v15, %v892_v36  ;;  %v472_v22 = vcombine.high %v160_v15, %v160_v15 }
  0xe2   :  { %v495_v58 = vrot.slane %v479_v46, %v892_v36  ;;  %v487_v16 = vcombine.high %v479_v46, %v479_v46  ;;  %v486_v53 = vrot.slane %v472_v22, %v892_v36 }
  0xe4   :  { %v524_v17 = vrot.slane %v495_v58, %v915_v3  ;;  %v509_v20 = vrot.slane %v487_v16, %v892_v36  ;;  %v517_v21 = vcombine.high %v495_v58, %v495_v58  ;;  %v502_v57 = vrot.slane %v486_v53, %v892_v36 }
  0xe5   :  { %v488_v30 = vcombine.high %v486_v53, %v486_v53 }
  0xe6   :  { %v601_v23 = vmul.f32 %v870_v4, %v524_v17  ;;  %v528_v41 = vrot.slane %v509_v20, %v915_v3  ;;  %v532_v24 = vrot.slane %v517_v21, %v915_v3  ;;  %v519_v27 = vcombine.high %v509_v20, %v509_v20 }
  0xe7   :  { %v540_v52 = vrot.slane %v502_v57, %v915_v3  ;;  %v518_v26 = vcombine.high %v502_v57, %v502_v57  ;;  %v516_v28 = vrot.slane %v488_v30, %v892_v36 }
  0xe8   :  { %v609_v35 = vadd.f32 %v601_v23, %v463_v39  ;;  %v602_v29 = vmul.f32 %v884_v19, %v528_v41  ;;  %v603_v31 = vmul.f32 %v897_v45, %v532_v24  ;;  %v536_v32 = vrot.slane %v519_v27, %v915_v3 }
  0xe9   :  { %v605_v11 = vmul.f32 %v951_v60, %v540_v52  ;;  %v548_v4 = vrot.slane %v518_v26, %v915_v3  ;;  %v544_v25 = vrot.slane %v516_v28, %v915_v3  ;;  %v520_v40 = vcombine.high %v516_v28, %v516_v28 }
  0xea   :  { %v610_v37 = vadd.f32 %v602_v29, %v464_v51  ;;  %v611_v42 = vadd.f32 %v603_v31, %v465_v55  ;;  %v604_v44 = vmul.f32 %v918_v8, %v536_v32  ;;  %617 = vxpose.xlu1.b32.start [1/8] (short) %v609_v35, 128 }
  0xeb   :  { %v613_v36 = vadd.f32 %v605_v11, %v467_v13  ;;  %v607_v39 = vmul.f32 %v594_v47, %v548_v4  ;;  %v606_v19 = vmul.f32 %v985_v54, %v544_v25  ;;  %v552_v45 = vrot.slane %v520_v40, %v915_v3 }
  0xec   :  { %v612_v33 = vadd.f32 %v604_v44, %v466_v62 }
  0xed   :  { %v615_v60 = vadd.f32 %v607_v39, %v469_v38  ;;  %v614_v56 = vadd.f32 %v606_v19, %v468_v34  ;;  %v608_v59 = vmul.f32 %v599_v63, %v552_v45 }
  0xee   :  { %618 = vxpose.xlu1.b32.cont [2/8] (short) %v610_v37, 128 }
  0xef   :  { %v616_v50 = vadd.f32 %v608_v59, %v470_v6 }
  0xf2   :  { %619 = vxpose.xlu1.b32.cont [3/8] (short) %v611_v42, 128 }
  0xf6   :  { %620 = vxpose.xlu1.b32.cont [4/8] (short) %v612_v33, 128 }
  0xfa   :  { %621 = vxpose.xlu1.b32.cont [5/8] (short) %v613_v36, 128 }
  0xfe   :  { %622 = vxpose.xlu1.b32.cont [6/8] (short) %v614_v56, 128 }
 0x102   :  { %623 = vxpose.xlu1.b32.cont [7/8] (short) %v615_v60, 128 }
 0x106   :  { %624 = vxpose.xlu1.b32.end [8/8] (short) %v616_v50, 128 }
 0x16a   :  { %v633_v8 = vpop.trf.xlu1 }
 0x16b   :  { %650 = vst.msk [vmem:[%s1103_s3] sm:$0xff] %vm649_vm9, %v633_v8 }
 0x16e   :  { %v634_v3 = vpop.trf.xlu1 }
 0x16f   :  { %651 = vst.msk [vmem:[%s1103_s3 + $0x8] sm:$0xff] %vm649_vm9, %v634_v3 }
 0x172   :  { %v635_v54 = vpop.trf.xlu1 }
 0x173   :  { %652 = vst.msk [vmem:[%s1103_s3 + $0x10] sm:$0xff] %vm649_vm9, %v635_v54 }
 0x176   :  { %v636_v51 = vpop.trf.xlu1 }
 0x177   :  { %653 = vst.msk [vmem:[%s1103_s3 + $0x18] sm:$0xff] %vm649_vm9, %v636_v51 }
 0x17a   :  { %v637_v55 = vpop.trf.xlu1 }
 0x17b   :  { %654 = vst.msk [vmem:[%s1103_s3 + $0x20] sm:$0xff] %vm649_vm9, %v637_v55 }
 0x17e   :  { %v638_v13 = vpop.trf.xlu1 }
 0x17f   :  { %655 = vst.msk [vmem:[%s1103_s3 + $0x28] sm:$0xff] %vm649_vm9, %v638_v13 }
 0x182   :  { %v639_v0 = vpop.trf.xlu1 }
 0x183   :  { %656 = vst.msk [vmem:[%s1103_s3 + $0x30] sm:$0xff] %vm649_vm9, %v639_v0 }
 0x186   :  { %v640_v62 = vpop.trf.xlu1 }
 0x187   :  { %657 = vst.msk [vmem:[%s1103_s3 + $0x38] sm:$0xff] %vm649_vm9, %v640_v62 }
 0x18a   :  { %v641_v2 = vpop.trf.xlu1 }
 0x18b   :  { %658 = vst.msk [vmem:[%s1103_s3 + $0x40] sm:$0xff] %vm649_vm9, %v641_v2 }
 0x18e   :  { %v642_v48 = vpop.trf.xlu1 }
 0x18f   :  { %659 = vst.msk [vmem:[%s1103_s3 + $0x48] sm:$0xff] %vm649_vm9, %v642_v48 }
 0x192   :  { %v643_v61 = vpop.trf.xlu1 }
 0x193   :  { %660 = vst.msk [vmem:[%s1103_s3 + $0x50] sm:$0xff] %vm649_vm9, %v643_v61 }
 0x196   :  { %v644_v34 = vpop.trf.xlu1 }
 0x197   :  { %661 = vst.msk [vmem:[%s1103_s3 + $0x58] sm:$0xff] %vm649_vm9, %v644_v34 }
 0x19a   :  { %v645_v38 = vpop.trf.xlu1 }
 0x19b   :  { %662 = vst.msk [vmem:[%s1103_s3 + $0x60] sm:$0xff] %vm649_vm9, %v645_v38 }
 0x19e   :  { %v646_v43 = vpop.trf.xlu1 }
 0x19f   :  { %663 = vst.msk [vmem:[%s1103_s3 + $0x68] sm:$0xff] %vm649_vm9, %v646_v43 }
 0x1a2   :  { %v647_v5 = vpop.trf.xlu1 }
 0x1a3   :  { %664 = vst.msk [vmem:[%s1103_s3 + $0x70] sm:$0xff] %vm649_vm9, %v647_v5 }
 0x1a6   :  { %v648_v7 = vpop.trf.xlu1 }
 0x1a7   :  { %665 = vst.msk [vmem:[%s1103_s3 + $0x78] sm:$0xff] %vm649_vm9, %v648_v7 }

</bundles_post_ra>
